<compile_context>
chip_gen: v5e
topology: v5e:2x2
jax: 0.10.0
libtpu: 0.0.40
codegen_flags: <defaults>
</compile_context>

<pallas_src>
import jax
import jax.numpy as jnp
from jax.experimental import pallas as pl
from jax.experimental.pallas import tpu as pltpu

LANE = 128       # vreg lane width
SUBLANE = 8      # vreg sublane count (f32)
NEG_BIG = -1e30  # bias for padded logit lanes -> exp underflows to 0


def _round_up(x, m):
    return (x + m - 1) // m * m


def _largest_divisor(total, cap, multiple_of=1):
    """Largest divisor of `total` that is <= cap and a multiple of `multiple_of`."""
    assert total % multiple_of == 0
    best = multiple_of
    d = multiple_of
    while d <= min(total, cap):
        if total % d == 0:
            best = d
        d += multiple_of
    return best


# --------------------------------------------------------------------------
# Phase 1: parallel input projection  xp = x @ [W_xh | W_xo] + [bh | bo(-inf)]
# --------------------------------------------------------------------------
def _proj_kernel(x_ref, w_ref, b_ref, o_ref):
    # x_ref: (tm, I)  w_ref: (I, h_pad+o_pad)  b_ref: (1, h_pad+o_pad)
    o_ref[...] = (jnp.dot(x_ref[...], w_ref[...],
                          preferred_element_type=jnp.float32)
                  + b_ref[...]).astype(o_ref.dtype)


# --------------------------------------------------------------------------
# Phase 2: sequential recurrence, Tc timesteps unrolled per grid step
# --------------------------------------------------------------------------
def _make_recurrent_kernel(h_pad, t_chunk):
    def kernel(xp_ref, wh_ref, h0_ref, out_ref, hfin_ref, h_scr):
        # xp_ref  : (Tc, b_pad, h_pad+o_pad)  precomputed x-projection (+bias)
        # wh_ref  : (h_pad, h_pad+o_pad)      resident fused [W_hh | W_ho]
        # h0_ref  : (b_pad, h_pad)            initial hidden, resident
        # out_ref : (Tc, b_pad, o_pad)        log-softmax outputs of this chunk
        # hfin_ref: (b_pad, h_pad)            final hidden (written last step)
        # h_scr   : (b_pad, h_pad)            hidden carried across chunks
        c = pl.program_id(0)

        @pl.when(c == 0)
        def _init():
            h_scr[...] = h0_ref[...]

        h = h_scr[...]
        # Unrolled time loop: hidden is carried purely in vregs inside the
        # chunk; only one scratch store per chunk boundary.
        for t in range(t_chunk):
            y = xp_ref[t] + jnp.dot(h, wh_ref[...],
                                    preferred_element_type=jnp.float32)
            h = y[:, :h_pad]          # padded hidden lanes stay exactly 0
            logits = y[:, h_pad:]     # padded logit lanes are ~ -1e30

            m = jnp.max(logits, axis=-1, keepdims=True)
            shifted = logits - m
            lse = jnp.log(jnp.sum(jnp.exp(shifted), axis=-1, keepdims=True))
            out_ref[t] = (shifted - lse).astype(out_ref.dtype)

        h_scr[...] = h

        @pl.when(c == pl.num_programs(0) - 1)
        def _fin():
            hfin_ref[...] = h.astype(hfin_ref.dtype)

    return kernel


# --------------------------------------------------------------------------
# Parameter init / packing
# --------------------------------------------------------------------------
def init_params(key, input_size, hidden_size, output_size):
    """Mimic PyTorch nn.Linear default init: U(-1/sqrt(fan_in), 1/sqrt(fan_in))."""
    fan_in = input_size + hidden_size
    bound = 1.0 / jnp.sqrt(fan_in)
    k1, k2, k3, k4 = jax.random.split(key, 4)
    return {
        "wh": jax.random.uniform(k1, (hidden_size, fan_in), jnp.float32,
                                 -bound, bound),
        "bh": jax.random.uniform(k2, (hidden_size,), jnp.float32,
                                 -bound, bound),
        "wo": jax.random.uniform(k3, (output_size, fan_in), jnp.float32,
                                 -bound, bound),
        "bo": jax.random.uniform(k4, (output_size,), jnp.float32,
                                 -bound, bound),
    }


def pack_params(params, input_size, hidden_size, output_size):
    """Split + pad PyTorch-layout weights into W_x (input proj) and W_h (recurrent)."""
    I, H, O = input_size, hidden_size, output_size
    h_pad = _round_up(H, LANE)
    o_pad = _round_up(O, LANE)
    n_pad = h_pad + o_pad

    wh = params["wh"]  # (H, I+H): rows = out features, cols = [x | h]
    wo = params["wo"]  # (O, I+H)

    # Input-projection weight: K stays at the natural I (no lane padding of xs).
    w_x = jnp.zeros((I, n_pad), jnp.float32)
    w_x = w_x.at[:, :H].set(wh[:, :I].T)                 # W_xh
    w_x = w_x.at[:, h_pad:h_pad + O].set(wo[:, :I].T)    # W_xo

    # Recurrent weight: K padded to h_pad with zero rows (padded hidden lanes
    # can never contaminate real lanes).
    w_h = jnp.zeros((h_pad, n_pad), jnp.float32)
    w_h = w_h.at[:H, :H].set(wh[:, I:].T)                # W_hh
    w_h = w_h.at[:H, h_pad:h_pad + O].set(wo[:, I:].T)   # W_ho

    b = jnp.zeros((1, n_pad), jnp.float32)
    b = b.at[0, :H].set(params["bh"])
    b = b.at[0, h_pad:h_pad + O].set(params["bo"])
    b = b.at[0, h_pad + O:].set(NEG_BIG)                 # mask padded logit lanes

    return {"w_x": w_x, "w_h": w_h, "b": b,
            "dims": (I, H, O, h_pad, o_pad)}


# --------------------------------------------------------------------------
# Wrappers
# --------------------------------------------------------------------------
def rnn_forward_sequence(xs, h0, packed):
    """Run the RNN cell over a whole sequence.

    xs : (T, B, input_size) f32
    h0 : (B, hidden_size)   f32
    returns (log_softmax outputs (T, B, output_size), final hidden (B, hidden_size))
    """
    I, H, O, h_pad, o_pad = packed["dims"]
    n_pad = h_pad + o_pad
    T, B, _ = xs.shape
    b_pad = max(SUBLANE, _round_up(B, SUBLANE))

    # ---- phase 1: one big parallel GEMM for the x-projection --------------
    xs_p = jnp.zeros((T, b_pad, I), jnp.float32).at[:, :B, :].set(xs)
    x_flat = xs_p.reshape(T * b_pad, I)
    m_rows = T * b_pad
    tm = _largest_divisor(m_rows, 512, multiple_of=SUBLANE)

    xp_flat = pl.pallas_call(
        _proj_kernel,
        out_shape=jax.ShapeDtypeStruct((m_rows, n_pad), jnp.float32),
        grid_spec=pltpu.PrefetchScalarGridSpec(
            num_scalar_prefetch=0,
            grid=(m_rows // tm,),
            in_specs=[
                pl.BlockSpec((tm, I), lambda i: (i, 0)),
                pl.BlockSpec(packed["w_x"].shape, lambda i: (0, 0)),
                pl.BlockSpec(packed["b"].shape, lambda i: (0, 0)),
            ],
            out_specs=pl.BlockSpec((tm, n_pad), lambda i: (i, 0)),
        ),
        compiler_params=pltpu.CompilerParams(
            dimension_semantics=("parallel",),
        ),
    )(x_flat, packed["w_x"], packed["b"])

    xp = xp_flat.reshape(T, b_pad, n_pad)   # contiguous leading-dim reshape

    # ---- phase 2: serialized recurrence, chunked over time ----------------
    t_chunk = _largest_divisor(T, 32)       # Tc timesteps per grid step
    h0_p = jnp.zeros((b_pad, h_pad), jnp.float32).at[:B, :H].set(h0)

    kernel = _make_recurrent_kernel(h_pad, t_chunk)
    out_p, hfin_p = pl.pallas_call(
        kernel,
        out_shape=(
            jax.ShapeDtypeStruct((T, b_pad, o_pad), jnp.float32),
            jax.ShapeDtypeStruct((b_pad, h_pad), jnp.float32),
        ),
        grid_spec=pltpu.PrefetchScalarGridSpec(
            num_scalar_prefetch=0,
            grid=(T // t_chunk,),
            in_specs=[
                # per-chunk precomputed x-projection block
                pl.BlockSpec((t_chunk, b_pad, n_pad), lambda c: (c, 0, 0)),
                # recurrent weight / h0: constant block index -> VMEM-resident
                pl.BlockSpec(packed["w_h"].shape, lambda c: (0, 0)),
                pl.BlockSpec((b_pad, h_pad), lambda c: (0, 0)),
            ],
            out_specs=(
                pl.BlockSpec((t_chunk, b_pad, o_pad), lambda c: (c, 0, 0)),
                pl.BlockSpec((b_pad, h_pad), lambda c: (0, 0)),
            ),
            scratch_shapes=[
                pltpu.VMEM((b_pad, h_pad), jnp.float32),   # chunk-carried hidden
            ],
        ),
        compiler_params=pltpu.CompilerParams(
            # time axis is a sequential recurrence
            dimension_semantics=("arbitrary",),
        ),
    )(xp, packed["w_h"], h0_p)

    return out_p[:, :B, :O], hfin_p[:B, :H]


def rnn_forward(x, hidden, packed):
    """Single-step entry point with the exact semantics of RNN.forward."""
    out_seq, new_hidden = rnn_forward_sequence(x[None], hidden, packed)
    return out_seq[0], new_hidden


# --------------------------------------------------------------------------
# Reference + test
# --------------------------------------------------------------------------
def _reference_step(x, hidden, params):
    combined = jnp.concatenate([x, hidden], axis=1)
    new_hidden = combined @ params["wh"].T + params["bh"]
    logits = combined @ params["wo"].T + params["bo"]
    return jax.nn.log_softmax(logits, axis=1), new_hidden


if __name__ == "__main__":
    B, T, INPUT, HIDDEN, OUTPUT = 2, 8, 16, 32, 8

    key = jax.random.PRNGKey(0)
    kp, kx = jax.random.split(key)

    params = init_params(kp, INPUT, HIDDEN, OUTPUT)
    packed = pack_params(params, INPUT, HIDDEN, OUTPUT)

    xs = jax.random.normal(kx, (T, B, INPUT), jnp.float32)
    h0 = jnp.zeros((B, HIDDEN), jnp.float32)  # module's init_hidden, broadcast

    # fused-sequence kernels
    outs, h_final = rnn_forward_sequence(xs, h0, packed)
    outs = jax.block_until_ready(outs)
    h_final = jax.block_until_ready(h_final)

    # pure-JAX reference: apply the module's forward per timestep
    h = h0
    ref_outs = []
    for t in range(T):
        o, h = _reference_step(xs[t], h, params)
        ref_outs.append(o)
    ref_outs = jnp.stack(ref_outs)

    assert jnp.allclose(outs, ref_outs, atol=1e-5, rtol=1e-5)
    assert jnp.allclose(h_final, h, atol=1e-5, rtol=1e-5)

    # single-step entry point matches the module's forward exactly
    out1, h1 = rnn_forward(xs[0], h0, packed)
    ref1, rh1 = _reference_step(xs[0], h0, params)
    assert jnp.allclose(jax.block_until_ready(out1), ref1, atol=1e-5, rtol=1e-5)
    assert jnp.allclose(jax.block_until_ready(h1), rh1, atol=1e-5, rtol=1e-5)

    print("KERNEL_OK")
</pallas_src>

<mosaic_0001>
module attributes {stable_mosaic.version = 11 : i64} {
  func.func @_proj_kernel(%arg0: i32, %arg1: memref<64x16xf32, #tpu.memory_space<vmem>>, %arg2: memref<16x256xf32, #tpu.memory_space<vmem>>, %arg3: memref<1x256xf32, #tpu.memory_space<vmem>>, %arg4: memref<64x256xf32, #tpu.memory_space<vmem>>) attributes {dimension_semantics = [#tpu.dimension_semantics<parallel>], iteration_bounds = array<i64: 1>, scalar_prefetch = 0 : i64, scratch_operands = 0 : i64, tpu.core_type = #tpu.core_type<tc>, window_params = [{transform_indices = @transform_0, window_bounds = array<i64: 64, 16>}, {pipeline_mode = #tpu.pipeline_mode<synchronous>, transform_indices = @transform_1, window_bounds = array<i64: 16, 256>}, {pipeline_mode = #tpu.pipeline_mode<synchronous>, transform_indices = @transform_2, window_bounds = array<i64: 1, 256>}, {transform_indices = @transform_3, window_bounds = array<i64: 64, 256>}]} {
    %c0 = arith.constant 0 : index
    %c0_0 = arith.constant 0 : index
    %0 = vector.load %arg1[%c0, %c0_0] : memref<64x16xf32, #tpu.memory_space<vmem>>, vector<64x16xf32>
    %c0_1 = arith.constant 0 : index
    %c0_2 = arith.constant 0 : index
    %1 = vector.load %arg2[%c0_1, %c0_2] : memref<16x256xf32, #tpu.memory_space<vmem>>, vector<16x256xf32>
    %cst = arith.constant dense<0.000000e+00> : vector<64x256xf32>
    %2 = tpu.matmul %0, %1, %cst {dimension_numbers = #tpu.dot_dimension_numbers<[1], [0], [0], [1], [0, 0, 1, 1], [], []>} : vector<64x16xf32>, vector<16x256xf32>, vector<64x256xf32> -> vector<64x256xf32>
    %c0_3 = arith.constant 0 : index
    %c0_4 = arith.constant 0 : index
    %3 = vector.load %arg3[%c0_3, %c0_4] : memref<1x256xf32, #tpu.memory_space<vmem>>, vector<1x256xf32>
    %4 = vector.broadcast %3 : vector<1x256xf32> to vector<64x256xf32>
    %5 = arith.addf %2, %4 : vector<64x256xf32>
    %c0_5 = arith.constant 0 : index
    %c0_6 = arith.constant 0 : index
    %6 = vector.load %arg4[%c0_5, %c0_6] : memref<64x256xf32, #tpu.memory_space<vmem>>, vector<64x256xf32>
    tpu.vector_store %arg4[%c0_5, %c0_6], %5 {strides = array<i32>} : memref<64x256xf32, #tpu.memory_space<vmem>>, vector<64x256xf32>,
    return
  }
  func.func @transform_0(%arg0: i32) -> (i32, i32) {
    %c0_i32 = arith.constant 0 : i32
    %c0_i32_0 = arith.constant 0 : i32
    return %arg0, %c0_i32 : i32, i32
  }
  func.func @transform_1(%arg0: i32) -> (i32, i32) {
    %c0_i32 = arith.constant 0 : i32
    %c0_i32_0 = arith.constant 0 : i32
    %c0_i32_1 = arith.constant 0 : i32
    return %c0_i32, %c0_i32_0 : i32, i32
  }
  func.func @transform_2(%arg0: i32) -> (i32, i32) {
    %c0_i32 = arith.constant 0 : i32
    %c0_i32_0 = arith.constant 0 : i32
    %c0_i32_1 = arith.constant 0 : i32
    return %c0_i32, %c0_i32_0 : i32, i32
  }
  func.func @transform_3(%arg0: i32) -> (i32, i32) {
    %c0_i32 = arith.constant 0 : i32
    %c0_i32_0 = arith.constant 0 : i32
    return %arg0, %c0_i32 : i32, i32
  }
}

</mosaic_0001>

<bundles_post_ra>
// kernel: tpu_custom_call.1
= control target key start
LH: loop header
LB: loop body
LE: loop exit
PB: predicated region body
PF: predicated region fallthrough
CT: control target
= control target key end

     0   :  { %vm33_vm0 = vcmask 130048   ;;  %s304_s0 = inlined_call_operand.vmem [shape: f32[64,16], index: 0, kind: input, shape index: {}]   ;;  %s305_s1 = inlined_call_operand.vmem [shape: f32[16,256], index: 1, kind: input, shape index: {}]   ;;  %s306_s2 = inlined_call_operand.vmem [shape: f32[1,256], index: 2, kind: input, shape index: {}]   ;;  %s307_s3 = inlined_call_operand.hbm [shape: f32[64,256], index: 3, kind: output, shape index: {}]  }
   0x1   :  { %v25_v0 = vld [vmem:[%s305_s1 + $0x10] sm:$0xff]  ;;  %v26_v1 = vld [vmem:[%s305_s1 + $0x18] sm:$0xff]  ;;  %v23_v2 = vld [vmem:[%s305_s1] sm:$0xff] }
   0x2   :  { %190 = vmatpush.msra.mxu2 %v25_v0  ;;  %192 = vmatpush.msra.mxu3 %v26_v1  ;;  %v24_v3 = vld [vmem:[%s305_s1 + $0x8] sm:$0xff]  ;;  %v19_v4 = vld [vmem:[%s304_s0 + $0x20] sm:$0xff] }
   0x3   :  { %72 = vmatpush.msra.mxu0 %v25_v0  ;;  %113 = vmatpush.msra.mxu1 %v26_v1  ;;  %v15_v5 = vld [vmem:[%s304_s0] sm:$0xff] }
   0x4   :  { %191 = vmatpush.msra.mxu2 %v23_v2  ;;  %193 = vmatpush.msra.mxu3 %v24_v3 }
   0x5   :  { %178 = vmatmul.msk.f32.vlgmr.msra.gmra.mxu2 %vm33_vm0, %v19_v4  ;;  %186 = vmatmul.msk.f32.vlgmr.msra.gmra.mxu3 %vm33_vm0, %v19_v4 }
   0x6   :  { %8 = vsyncpa [#allocation3], 0  ;;  %73 = vmatpush.msra.mxu0 %v23_v2  ;;  %114 = vmatpush.msra.mxu1 %v24_v3  ;;  %v20_v6 = vld [vmem:[%s304_s0 + $0x28] sm:$0xff]  ;;  %v21_v8 = vld [vmem:[%s304_s0 + $0x30] sm:$0xff]  ;;  %s162_s12 = sshll.u32 %s307_s3, 4  ;;  %s224_s13 = smov 256   ;;  %s163_s12 = int_to_ptr.hbm [resolvable:$true] %s162_s12 }
   0x7   :  { %174 = vmatmul.msk.f32.vlgmr.msra.gmra.mxu0 %vm33_vm0, %v15_v5  ;;  %182 = vmatmul.msk.f32.vlgmr.msra.gmra.mxu1 %vm33_vm0, %v15_v5  ;;  %v16_v7 = vld [vmem:[%s304_s0 + $0x8] sm:$0xff]  ;;  %v17_v9 = vld [vmem:[%s304_s0 + $0x10] sm:$0xff]  ;;  %v22_v10 = vld [vmem:[%s304_s0 + $0x38] sm:$0xff]  ;;  %s225_s14 = smov 16  }
   0x8   :  { %v18_v11 = vld [vmem:[%s304_s0 + $0x18] sm:$0xff]  ;;  %v27_v12 = vld [vmem:[%s306_s2] sm:$0x3]  ;;  %s223_s0 = smov [#allocation2]  }
   0x9   :  { %v29_v13 = vperm.slane %v27_v12, 0  ;;  %v30_v14 = vperm.slane %v27_v12, 1  ;;  %s160_s2 = sshll.u32 %s223_s0, 4  ;;  %s161_s2 = int_to_ptr.vmem [resolvable:$true] %s160_s2 }
   0xd   :  { %179 = vmatmul.msk.f32.gmra.mxu2 %vm33_vm0, %v20_v6  ;;  %187 = vmatmul.msk.f32.gmra.mxu3 %vm33_vm0, %v20_v6 }
   0xf   :  { %175 = vmatmul.msk.f32.gmra.mxu0 %vm33_vm0, %v16_v7  ;;  %183 = vmatmul.msk.f32.gmra.mxu1 %vm33_vm0, %v16_v7 }
  0x15   :  { %180 = vmatmul.msk.f32.gmra.mxu2 %vm33_vm0, %v21_v8  ;;  %188 = vmatmul.msk.f32.gmra.mxu3 %vm33_vm0, %v21_v8 }
  0x17   :  { %176 = vmatmul.msk.f32.gmra.mxu0 %vm33_vm0, %v17_v9  ;;  %184 = vmatmul.msk.f32.gmra.mxu1 %vm33_vm0, %v17_v9 }
  0x1d   :  { %181 = vmatmul.msk.f32.gmra.mxu2 %vm33_vm0, %v22_v10  ;;  %189 = vmatmul.msk.f32.gmra.mxu3 %vm33_vm0, %v22_v10 }
  0x1f   :  { %177 = vmatmul.msk.f32.gmra.mxu0 %vm33_vm0, %v18_v11  ;;  %185 = vmatmul.msk.f32.gmra.mxu1 %vm33_vm0, %v18_v11 }
  0x84   :  { %v75_v15 = vpop.f32.mrf.mxu0  ;;  %v116_v16 = vpop.f32.mrf.mxu1 }
  0x85   :  { %v76_v17 = vadd.f32 %v75_v15, %v29_v13  ;;  %v117_v18 = vadd.f32 %v116_v16, %v30_v14 }
  0x87   :  { %140 = vst [vmem:[#allocation2] sm:$0xff] %v76_v17 }
  0x88   :  { %v87_v19 = vpop.f32.mrf.mxu2  ;;  %141 = vst [vmem:[#allocation2 + $0x8] sm:$0xff] %v117_v18  ;;  %v128_v20 = vpop.f32.mrf.mxu3 }
  0x89   :  { %v88_v21 = vadd.f32 %v87_v19, %v29_v13  ;;  %v129_v22 = vadd.f32 %v128_v20, %v30_v14 }
  0x8b   :  { %148 = vst [vmem:[#allocation2 + $0x40] sm:$0xff] %v88_v21 }
  0x8c   :  { %149 = vst [vmem:[#allocation2 + $0x48] sm:$0xff] %v129_v22  ;;  %v78_v23 = vpop.f32.mrf.mxu0  ;;  %v119_v24 = vpop.f32.mrf.mxu1 }
  0x8d   :  { %v79_v25 = vadd.f32 %v78_v23, %v29_v13  ;;  %v120_v26 = vadd.f32 %v119_v24, %v30_v14 }
  0x8f   :  { %142 = vst [vmem:[#allocation2 + $0x10] sm:$0xff] %v79_v25 }
  0x90   :  { %v90_v27 = vpop.f32.mrf.mxu2  ;;  %143 = vst [vmem:[#allocation2 + $0x18] sm:$0xff] %v120_v26  ;;  %v131_v28 = vpop.f32.mrf.mxu3 }
  0x91   :  { %v91_v29 = vadd.f32 %v90_v27, %v29_v13  ;;  %v132_v30 = vadd.f32 %v131_v28, %v30_v14 }
  0x93   :  { %150 = vst [vmem:[#allocation2 + $0x50] sm:$0xff] %v91_v29 }
  0x94   :  { %151 = vst [vmem:[#allocation2 + $0x58] sm:$0xff] %v132_v30  ;;  %v81_v31 = vpop.f32.mrf.mxu0  ;;  %v122_v32 = vpop.f32.mrf.mxu1 }
  0x95   :  { %v82_v33 = vadd.f32 %v81_v31, %v29_v13  ;;  %v123_v34 = vadd.f32 %v122_v32, %v30_v14 }
  0x97   :  { %144 = vst [vmem:[#allocation2 + $0x20] sm:$0xff] %v82_v33 }
  0x98   :  { %v93_v35 = vpop.f32.mrf.mxu2  ;;  %145 = vst [vmem:[#allocation2 + $0x28] sm:$0xff] %v123_v34  ;;  %v134_v36 = vpop.f32.mrf.mxu3 }
  0x99   :  { %v94_v37 = vadd.f32 %v93_v35, %v29_v13  ;;  %v135_v38 = vadd.f32 %v134_v36, %v30_v14 }
  0x9b   :  { %152 = vst [vmem:[#allocation2 + $0x60] sm:$0xff] %v94_v37 }
  0x9c   :  { %153 = vst [vmem:[#allocation2 + $0x68] sm:$0xff] %v135_v38  ;;  %v84_v39 = vpop.f32.mrf.mxu0  ;;  %v125_v40 = vpop.f32.mrf.mxu1 }
  0x9d   :  { %v85_v41 = vadd.f32 %v84_v39, %v29_v13  ;;  %v126_v42 = vadd.f32 %v125_v40, %v30_v14 }
  0x9f   :  { %146 = vst [vmem:[#allocation2 + $0x30] sm:$0xff] %v85_v41 }
  0xa0   :  { %v96_v43 = vpop.f32.mrf.mxu2  ;;  %147 = vst [vmem:[#allocation2 + $0x38] sm:$0xff] %v126_v42  ;;  %v137_v44 = vpop.f32.mrf.mxu3 }
  0xa1   :  { %v97_v45 = vadd.f32 %v96_v43, %v29_v13  ;;  %v138_v46 = vadd.f32 %v137_v44, %v30_v14 }
  0xa3   :  { %154 = vst [vmem:[#allocation2 + $0x70] sm:$0xff] %v97_v45 }
  0xa4   :  { %155 = vst [vmem:[#allocation2 + $0x78] sm:$0xff] %v138_v46 }
  0xa5   :  { %168 = dma.vmem_to_hbm [thread:$0]  %s161_s2, 2048, %s163_s12, [#allocation3], %s224_s13, %s224_s13, %s225_s14  }
  0xa6   :  { %221 = dma.done.wait [#allocation3], 2048  }
  0xa7   :  { %222 = vsyncadd [#allocation3], 4294965248 }
  0xa8   :  { %173 = vsyncpa [#allocation3], 1 }

</bundles_post_ra>
